<compile_context>
chip_gen: v7x
topology: tpu7x:2x2x1
jax: 0.10.0
libtpu: 0.0.40
codegen_flags: <defaults>
</compile_context>

<pallas_src>
import jax
import jax.numpy as jnp
from jax import lax
from jax.experimental import pallas as pl
from jax.experimental.pallas import tpu as pltpu


# ----------------------------------------------------------------------------
# Fused kernel: tokens -> one-hot counts -> pooled embedding -> MLP -> logits
#   tokens_ref: VMEM (B, S)            int32
#   slab_ref:   VMEM (ROWS, LANE)      float32  (emb | w1 | w2 | w3 | w4 | biases)
#   out_ref:    VMEM (B, LANE)         float32  (lane-dense padded logits)
# ----------------------------------------------------------------------------
def _make_kernel(v_pad, lane, offs):
    o_w1, o_w2, o_w3, o_w4, o_b = offs

    def kernel(tokens_ref, slab_ref, out_ref):
        B, S = tokens_ref.shape

        tok = tokens_ref[...]                                    # (B, S) int32
        ids = lax.broadcasted_iota(jnp.int32, (B, v_pad), 1)     # hoisted once

        # counts[b, v] = #{s : tokens[b, s] == v}; int32 accumulation, single
        # cast to f32 before the MXU.  S is tiny/static -> unroll.
        # TODO(synk): for S >~ 16 switch to lax.fori_loop(..., unroll=4/8) to
        # bound vreg live ranges.
        counts_i = (tok[:, 0:1] == ids).astype(jnp.int32)
        for s in range(1, S):
            counts_i = counts_i + (tok[:, s:s + 1] == ids).astype(jnp.int32)
        counts = counts_i.astype(jnp.float32)

        # Static slab views (zero-cost, no extra DMA descriptors).
        emb = slab_ref[0:v_pad, :]
        w1 = slab_ref[o_w1:o_w1 + lane, :]
        w2 = slab_ref[o_w2:o_w2 + lane, :]
        w3 = slab_ref[o_w3:o_w3 + lane, :]
        w4 = slab_ref[o_w4:o_w4 + lane, :]
        b1 = slab_ref[o_b + 0:o_b + 1, :]
        b2 = slab_ref[o_b + 1:o_b + 2, :]
        b3 = slab_ref[o_b + 2:o_b + 3, :]
        b4 = slab_ref[o_b + 3:o_b + 4, :]

        # Mean-pooled embeddings via a single MXU matmul; 1/S already folded
        # into w1, BN folded into w/b, Dropout(0.5) identity in eval.
        pooled = jnp.dot(counts, emb, preferred_element_type=jnp.float32)

        h = jnp.maximum(jnp.dot(pooled, w1, preferred_element_type=jnp.float32) + b1, 0.0)
        h = jnp.maximum(jnp.dot(h, w2, preferred_element_type=jnp.float32) + b2, 0.0)
        h = jnp.maximum(jnp.dot(h, w3, preferred_element_type=jnp.float32) + b3, 0.0)
        out_ref[...] = jnp.dot(h, w4, preferred_element_type=jnp.float32) + b4

    return kernel


# ----------------------------------------------------------------------------
# Offline parameter packing:
#   * fold BatchNorm (eval) into the preceding Linear
#   * fold the 1/S mean scale into w1
#   * pad every tensor to the uniform LANE width (zeros) and the embedding
#     rows (vocab) to a multiple of 128
#   * concatenate everything into one (ROWS, LANE) f32 slab
# Tokens in [V, v_pad) would read zero embedding rows (contribute 0 to the
# mean) instead of erroring like torch.nn.Embedding -- documented difference.
# ----------------------------------------------------------------------------
def _round_up(x, m):
    return ((x + m - 1) // m) * m


def fold_bn(gamma, beta, running_mean, running_var, eps=1e-5):
    scale = gamma / jnp.sqrt(running_var + eps)
    shift = beta - running_mean * scale
    return scale[None, :], shift[None, :]


def prepare_inference_params(params, embed_dim, num_classes, seq_len):
    dims = [embed_dim, 128, 64, 32, num_classes]
    lane = _round_up(max(dims + [128]), 128)          # uniform padded width
    V = params["emb"].shape[0]
    v_pad = _round_up(max(V, 128), 128)

    def pad_to(a, rows, cols):
        return jnp.pad(a, ((0, rows - a.shape[0]), (0, cols - a.shape[1])))

    emb = pad_to(params["emb"], v_pad, lane)

    ws, bs = [], []
    for i, (_din, _dout) in enumerate(zip(dims[:-1], dims[1:]), start=1):
        w, b = params[f"w{i}"], params[f"b{i}"]
        if i <= 3:                                     # Linear -> BN -> ReLU
            s, t = params[f"s{i}"], params[f"t{i}"]
            w = w * s
            b = b * s + t
        if i == 1:                                     # fold the 1/S mean scale
            w = w * (1.0 / float(seq_len))
        ws.append(pad_to(w, lane, lane))
        bs.append(pad_to(b, 1, lane))

    bias_block = jnp.pad(jnp.concatenate(bs, axis=0), ((0, 4), (0, 0)))  # 8 rows

    slab = jnp.concatenate([emb] + ws + [bias_block], axis=0)
    offsets = (v_pad, v_pad + lane, v_pad + 2 * lane, v_pad + 3 * lane,
               v_pad + 4 * lane)
    return {"slab": slab, "v_pad": v_pad, "lane": lane, "offsets": offsets}


# ----------------------------------------------------------------------------
# Wrapper: one gridless pallas_call, everything resident in VMEM.
# ----------------------------------------------------------------------------
def text_classifier_forward(tokens, packed, num_classes):
    B = tokens.shape[0]
    lane = packed["lane"]
    vmem = pl.BlockSpec(memory_space=pltpu.MemorySpace.VMEM)
    kernel = _make_kernel(packed["v_pad"], lane, packed["offsets"])

    # TODO(synk): for realistic vocab/embed_dim the embedding table must stay
    # in HBM (memory_space=pl.ANY) with a prefetch-driven row gather (or a
    # vocab grid axis + VMEM accumulator), weights stored as bf16, and a batch
    # grid axis marked "parallel" so v7x's 2 TensorCores are used; at this toy
    # size a single gridless call with a fully VMEM-resident slab is optimal.
    padded_logits = pl.pallas_call(
        kernel,
        out_shape=jax.ShapeDtypeStruct((B, lane), jnp.float32),
        in_specs=[vmem, vmem],
        out_specs=vmem,
    )(tokens, packed["slab"])
    return padded_logits[:, :num_classes]


# ----------------------------------------------------------------------------
# Deterministic init + pure-JAX reference
# ----------------------------------------------------------------------------
def init_params(key, vocab_size, embed_dim, num_classes):
    ks = jax.random.split(key, 12)
    dims = [embed_dim, 128, 64, 32, num_classes]
    params = {"emb": jax.random.normal(ks[0], (vocab_size, embed_dim), jnp.float32) * 0.1}

    for i, (din, dout) in enumerate(zip(dims[:-1], dims[1:]), start=1):
        params[f"w{i}"] = jax.random.normal(
            ks[2 * i - 1], (din, dout), jnp.float32) * (1.0 / jnp.sqrt(din))
        params[f"b{i}"] = jax.random.normal(ks[2 * i], (1, dout), jnp.float32) * 0.01

    # BatchNorm1d params (eval mode, running stats), deterministic but non-trivial.
    for i, dout in enumerate(dims[1:4], start=1):
        gamma = 1.0 + 0.05 * jnp.sin(jnp.arange(dout, dtype=jnp.float32))
        beta = 0.02 * jnp.cos(jnp.arange(dout, dtype=jnp.float32))
        rmean = 0.01 * jnp.arange(dout, dtype=jnp.float32) / dout
        rvar = 1.0 + 0.1 * (jnp.arange(dout, dtype=jnp.float32) / dout)
        s, t = fold_bn(gamma, beta, rmean, rvar)
        params[f"s{i}"] = s
        params[f"t{i}"] = t
    return params


def reference_forward(tokens, params):
    pooled = jnp.take(params["emb"], tokens, axis=0).mean(axis=1)
    h = pooled
    for i in range(1, 4):
        h = h @ params[f"w{i}"] + params[f"b{i}"]
        h = jnp.maximum(h * params[f"s{i}"] + params[f"t{i}"], 0.0)
    return h @ params["w4"] + params["b4"]


if __name__ == "__main__":
    vocab_size, embed_dim, num_classes = 50, 32, 4
    batch, seq = 8, 8

    key = jax.random.PRNGKey(0)
    k_tok, k_par = jax.random.split(key)
    tokens = jax.random.randint(k_tok, (batch, seq), 0, vocab_size, dtype=jnp.int32)
    params = init_params(k_par, vocab_size, embed_dim, num_classes)
    packed = prepare_inference_params(params, embed_dim, num_classes, seq)

    logits = text_classifier_forward(tokens, packed, num_classes)
    logits = jax.block_until_ready(logits)

    ref = reference_forward(tokens, params)
    assert logits.shape == (batch, num_classes)
    assert jnp.allclose(logits, ref, atol=1e-4, rtol=1e-4), "mismatch vs JAX reference"

    print("KERNEL_OK")
</pallas_src>

<mosaic_0001>
module attributes {stable_mosaic.version = 11 : i64} {
  func.func @kernel(%arg0: memref<8x8xi32, #tpu.memory_space<vmem>>, %arg1: memref<648x128xf32, #tpu.memory_space<vmem>>, %arg2: memref<8x128xf32, #tpu.memory_space<vmem>>) attributes {dimension_semantics = [], scalar_prefetch = 0 : i64, scratch_operands = 0 : i64, tpu.core_type = #tpu.core_type<tc>} {
    %c0 = arith.constant 0 : index
    %c0_0 = arith.constant 0 : index
    %0 = vector.load %arg0[%c0, %c0_0] : memref<8x8xi32, #tpu.memory_space<vmem>>, vector<8x8xi32>
    %1 = tpu.iota {dimensions = array<i32: 1>} : vector<8x128xi32>
    %2 = vector.extract_strided_slice %0 {offsets = [0, 0], sizes = [8, 1], strides = [1, 1]} : vector<8x8xi32> to vector<8x1xi32>
    %3 = vector.broadcast %2 : vector<8x1xi32> to vector<8x128xi32>
    %4 = arith.cmpi eq, %3, %1 : vector<8x128xi32>
    %5 = arith.extui %4 : vector<8x128xi1> to vector<8x128xi32>
    %6 = vector.extract_strided_slice %0 {offsets = [0, 1], sizes = [8, 1], strides = [1, 1]} : vector<8x8xi32> to vector<8x1xi32>
    %7 = vector.broadcast %6 : vector<8x1xi32> to vector<8x128xi32>
    %8 = arith.cmpi eq, %7, %1 : vector<8x128xi32>
    %9 = arith.extui %8 : vector<8x128xi1> to vector<8x128xi32>
    %10 = arith.addi %5, %9 : vector<8x128xi32>
    %11 = vector.extract_strided_slice %0 {offsets = [0, 2], sizes = [8, 1], strides = [1, 1]} : vector<8x8xi32> to vector<8x1xi32>
    %12 = vector.broadcast %11 : vector<8x1xi32> to vector<8x128xi32>
    %13 = arith.cmpi eq, %12, %1 : vector<8x128xi32>
    %14 = arith.extui %13 : vector<8x128xi1> to vector<8x128xi32>
    %15 = arith.addi %10, %14 : vector<8x128xi32>
    %16 = vector.extract_strided_slice %0 {offsets = [0, 3], sizes = [8, 1], strides = [1, 1]} : vector<8x8xi32> to vector<8x1xi32>
    %17 = vector.broadcast %16 : vector<8x1xi32> to vector<8x128xi32>
    %18 = arith.cmpi eq, %17, %1 : vector<8x128xi32>
    %19 = arith.extui %18 : vector<8x128xi1> to vector<8x128xi32>
    %20 = arith.addi %15, %19 : vector<8x128xi32>
    %21 = vector.extract_strided_slice %0 {offsets = [0, 4], sizes = [8, 1], strides = [1, 1]} : vector<8x8xi32> to vector<8x1xi32>
    %22 = vector.broadcast %21 : vector<8x1xi32> to vector<8x128xi32>
    %23 = arith.cmpi eq, %22, %1 : vector<8x128xi32>
    %24 = arith.extui %23 : vector<8x128xi1> to vector<8x128xi32>
    %25 = arith.addi %20, %24 : vector<8x128xi32>
    %26 = vector.extract_strided_slice %0 {offsets = [0, 5], sizes = [8, 1], strides = [1, 1]} : vector<8x8xi32> to vector<8x1xi32>
    %27 = vector.broadcast %26 : vector<8x1xi32> to vector<8x128xi32>
    %28 = arith.cmpi eq, %27, %1 : vector<8x128xi32>
    %29 = arith.extui %28 : vector<8x128xi1> to vector<8x128xi32>
    %30 = arith.addi %25, %29 : vector<8x128xi32>
    %31 = vector.extract_strided_slice %0 {offsets = [0, 6], sizes = [8, 1], strides = [1, 1]} : vector<8x8xi32> to vector<8x1xi32>
    %32 = vector.broadcast %31 : vector<8x1xi32> to vector<8x128xi32>
    %33 = arith.cmpi eq, %32, %1 : vector<8x128xi32>
    %34 = arith.extui %33 : vector<8x128xi1> to vector<8x128xi32>
    %35 = arith.addi %30, %34 : vector<8x128xi32>
    %36 = vector.extract_strided_slice %0 {offsets = [0, 7], sizes = [8, 1], strides = [1, 1]} : vector<8x8xi32> to vector<8x1xi32>
    %37 = vector.broadcast %36 : vector<8x1xi32> to vector<8x128xi32>
    %38 = arith.cmpi eq, %37, %1 : vector<8x128xi32>
    %39 = arith.extui %38 : vector<8x128xi1> to vector<8x128xi32>
    %40 = arith.addi %35, %39 : vector<8x128xi32>
    %41 = arith.sitofp %40 : vector<8x128xi32> to vector<8x128xf32>
    %c0_1 = arith.constant 0 : index
    %c0_2 = arith.constant 0 : index
    %42 = vector.load %arg1[%c0_1, %c0_2] : memref<648x128xf32, #tpu.memory_space<vmem>>, vector<128x128xf32>
    %c128 = arith.constant 128 : index
    %c0_3 = arith.constant 0 : index
    %43 = vector.load %arg1[%c128, %c0_3] : memref<648x128xf32, #tpu.memory_space<vmem>>, vector<128x128xf32>
    %c256 = arith.constant 256 : index
    %c0_4 = arith.constant 0 : index
    %44 = vector.load %arg1[%c256, %c0_4] : memref<648x128xf32, #tpu.memory_space<vmem>>, vector<128x128xf32>
    %c384 = arith.constant 384 : index
    %c0_5 = arith.constant 0 : index
    %45 = vector.load %arg1[%c384, %c0_5] : memref<648x128xf32, #tpu.memory_space<vmem>>, vector<128x128xf32>
    %c512 = arith.constant 512 : index
    %c0_6 = arith.constant 0 : index
    %46 = vector.load %arg1[%c512, %c0_6] : memref<648x128xf32, #tpu.memory_space<vmem>>, vector<128x128xf32>
    %c640 = arith.constant 640 : index
    %c0_7 = arith.constant 0 : index
    %47 = vector.load %arg1[%c640, %c0_7] : memref<648x128xf32, #tpu.memory_space<vmem>>, vector<1x128xf32>
    %c641 = arith.constant 641 : index
    %c0_8 = arith.constant 0 : index
    %48 = vector.load %arg1[%c641, %c0_8] : memref<648x128xf32, #tpu.memory_space<vmem>>, vector<1x128xf32>
    %c642 = arith.constant 642 : index
    %c0_9 = arith.constant 0 : index
    %49 = vector.load %arg1[%c642, %c0_9] : memref<648x128xf32, #tpu.memory_space<vmem>>, vector<1x128xf32>
    %c643 = arith.constant 643 : index
    %c0_10 = arith.constant 0 : index
    %50 = vector.load %arg1[%c643, %c0_10] : memref<648x128xf32, #tpu.memory_space<vmem>>, vector<1x128xf32>
    %cst = arith.constant dense<0.000000e+00> : vector<8x128xf32>
    %51 = tpu.matmul %41, %42, %cst {dimension_numbers = #tpu.dot_dimension_numbers<[1], [0], [0], [1], [0, 0, 1, 1], [], []>} : vector<8x128xf32>, vector<128x128xf32>, vector<8x128xf32> -> vector<8x128xf32>
    %cst_11 = arith.constant dense<0.000000e+00> : vector<8x128xf32>
    %52 = tpu.matmul %51, %43, %cst_11 {dimension_numbers = #tpu.dot_dimension_numbers<[1], [0], [0], [1], [0, 0, 1, 1], [], []>} : vector<8x128xf32>, vector<128x128xf32>, vector<8x128xf32> -> vector<8x128xf32>
    %53 = vector.broadcast %47 : vector<1x128xf32> to vector<8x128xf32>
    %54 = arith.addf %52, %53 : vector<8x128xf32>
    %cst_12 = arith.constant 0.000000e+00 : f32
    %55 = vector.broadcast %cst_12 : f32 to vector<8x128xf32>
    %56 = arith.maximumf %54, %55 : vector<8x128xf32>
    %cst_13 = arith.constant dense<0.000000e+00> : vector<8x128xf32>
    %57 = tpu.matmul %56, %44, %cst_13 {dimension_numbers = #tpu.dot_dimension_numbers<[1], [0], [0], [1], [0, 0, 1, 1], [], []>} : vector<8x128xf32>, vector<128x128xf32>, vector<8x128xf32> -> vector<8x128xf32>
    %58 = vector.broadcast %48 : vector<1x128xf32> to vector<8x128xf32>
    %59 = arith.addf %57, %58 : vector<8x128xf32>
    %cst_14 = arith.constant 0.000000e+00 : f32
    %60 = vector.broadcast %cst_14 : f32 to vector<8x128xf32>
    %61 = arith.maximumf %59, %60 : vector<8x128xf32>
    %cst_15 = arith.constant dense<0.000000e+00> : vector<8x128xf32>
    %62 = tpu.matmul %61, %45, %cst_15 {dimension_numbers = #tpu.dot_dimension_numbers<[1], [0], [0], [1], [0, 0, 1, 1], [], []>} : vector<8x128xf32>, vector<128x128xf32>, vector<8x128xf32> -> vector<8x128xf32>
    %63 = vector.broadcast %49 : vector<1x128xf32> to vector<8x128xf32>
    %64 = arith.addf %62, %63 : vector<8x128xf32>
    %cst_16 = arith.constant 0.000000e+00 : f32
    %65 = vector.broadcast %cst_16 : f32 to vector<8x128xf32>
    %66 = arith.maximumf %64, %65 : vector<8x128xf32>
    %cst_17 = arith.constant dense<0.000000e+00> : vector<8x128xf32>
    %67 = tpu.matmul %66, %46, %cst_17 {dimension_numbers = #tpu.dot_dimension_numbers<[1], [0], [0], [1], [0, 0, 1, 1], [], []>} : vector<8x128xf32>, vector<128x128xf32>, vector<8x128xf32> -> vector<8x128xf32>
    %68 = vector.broadcast %50 : vector<1x128xf32> to vector<8x128xf32>
    %69 = arith.addf %67, %68 : vector<8x128xf32>
    %c0_18 = arith.constant 0 : index
    %c0_19 = arith.constant 0 : index
    %70 = vector.load %arg2[%c0_18, %c0_19] : memref<8x128xf32, #tpu.memory_space<vmem>>, vector<8x128xf32>
    tpu.vector_store %arg2[%c0_18, %c0_19], %69 {strides = array<i32>} : memref<8x128xf32, #tpu.memory_space<vmem>>, vector<8x128xf32>,
    return
  }
}

</mosaic_0001>

<bundles_post_ra>
// kernel: tpu_custom_call.1
= control target key start
LH: loop header
LB: loop body
LE: loop exit
PB: predicated region body
PF: predicated region fallthrough
CT: control target
= control target key end

     0   :  { %7 = vsyncpa [#allocation3], 0  ;;  %s1173_s0 = inlined_call_operand.hbm [shape: s32[8,8], index: 0, kind: input, shape index: {}]   ;;  %s1174_s1 = inlined_call_operand.hbm [shape: f32[648,128], index: 1, kind: input, shape index: {}]   ;;  %s1175_s2 = inlined_call_operand.hbm [shape: f32[8,128], index: 2, kind: output, shape index: {}]  }
   0x1   :  { %8 = vsyncpa [#allocation6], 0 }
   0x2   :  { %9 = vsyncpa [#allocation4], 0  ;;  %s1040_s9 = smov [#allocation2]   ;;  %s1041_s11 = smov [#allocation5]  }
   0x3   :  { %s16_s10 = sshll.u32 %s1040_s9, 4  ;;  %s25_s12 = sshll.u32 %s1041_s11, 4  ;;  %s17_s10 = int_to_ptr.vmem [resolvable:$true] %s16_s10  ;;  %s1071_s12 = int_to_ptr.vmem [resolvable:$true] %s25_s12 }
   0x4   :  { %s968_s15 = scalar_lea.hbm %s1173_s0, 128 }
   0x5   :  { %p969_p0 = scmp.ne.s32.totalorder %s1173_s0, %s968_s15  ;;  %p972_p1 = scmp.lt.u32.totalorder %s968_s15, %s1173_s0 }
   0x7   :  { %p974_p2 = pnand %p972_p1, %p969_p0 }
   0x9   :  { %977 = shalt.err (!%p974_p2)
}
   0xa   :  { %s978_s20 = scalar_lea.vmem %s17_s10, 128  ;;  %p983_p4 = scmp.lt.s32.totalorder %s17_s10, %s17_s10 }
   0xb   :  { %p979_p3 = scmp.ne.s32.totalorder %s17_s10, %s978_s20  ;;  %p984_p5 = scmp.lt.s32.totalorder %s978_s20, %s978_s20 }
   0xd   :  { %p985_p6 = por %p984_p5, %p983_p4 }
   0xf   :  { %p986_p7 = pnand %p985_p6, %p979_p3 }
  0x11   :  { %989 = shalt.err (!%p986_p7)
}
  0x12   :  { %19 = dma.hbm_to_vmem [thread:$0]  %s1173_s0, 128, %s17_s10, [#allocation3]  }
  0x13   :  { %s990_s25 = scalar_lea.hbm %s1174_s1, 10368 }
  0x14   :  { %p991_p8 = scmp.ne.s32.totalorder %s1174_s1, %s990_s25  ;;  %p994_p9 = scmp.lt.u32.totalorder %s990_s25, %s1174_s1 }
  0x16   :  { %p996_p10 = pnand %p994_p9, %p991_p8 }
  0x18   :  { %999 = shalt.err (!%p996_p10)
}
  0x19   :  { %s1000_s30 = scalar_lea.vmem %s1071_s12, 10368  ;;  %p1005_p12 = scmp.lt.s32.totalorder %s1071_s12, %s1071_s12 }
  0x1a   :  { %p1001_p11 = scmp.ne.s32.totalorder %s1071_s12, %s1000_s30  ;;  %p1006_p13 = scmp.lt.s32.totalorder %s1000_s30, %s1000_s30 }
  0x1c   :  { %p1007_p0 = por %p1006_p13, %p1005_p12 }
  0x1e   :  { %p1008_p1 = pnand %p1007_p0, %p1001_p11 }
  0x20   :  { %1011 = shalt.err (!%p1008_p1)
}
  0x21   :  { %s1042_s0 = smov 128   ;;  %s1043_s3 = smov 8  }
  0x22   :  { %31 = dma.hbm_to_vmem [thread:$0]  %s1174_s1, 10368, %s1071_s12, [#allocation6], %s1042_s0, %s1042_s0, %s1043_s3  }
  0x23   :  { %1034 = dma.done.wait [#allocation3], 128  }
  0x24   :  { %1035 = vsyncadd [#allocation3], 4294967168 }
  0x25   :  { %1036 = dma.done.wait [#allocation6], 10368  }
  0x26   :  { %1037 = vsyncadd [#allocation6], 4294956928  ;;  %v1044_v0 = vmov 2   ;;  %v1045_v1 = vmov 0   ;;  %v1046_v2 = vmov 0.0|0.0   ;;  %v38_v3 = vld [vmem:[#allocation2] sm:$0xff]  ;;  %v39_v59 = vlaneseq }
  0x27   :  { %961 = vset.pattern.permute.xlu1 %v1044_v0  ;;  %959 = vset.pattern.permute.xlu0 %v1045_v1  ;;  %v89_v4 = vld [vmem:[#allocation5] sm:$0xff]  ;;  %v90_v5 = vld [vmem:[#allocation5 + $0x8] sm:$0xff]  ;;  %v91_v7 = vld [vmem:[#allocation5 + $0x10] sm:$0xff]  ;;  %v1047_v10 = vmov 3   ;;  %v1048_v11 = vmov 1   ;;  %v1049_v17 = vmov 4  }
  0x28   :  { %823 = vmatprep.subr.bf16.mxu0 %v1046_v2  ;;  %847 = vmatprep.subr.bf16.mxu1 %v1046_v2  ;;  %v824_v6 = vpack.c.bf16 %v90_v5, %v89_v4  ;;  %v92_v8 = vld [vmem:[#allocation5 + $0x18] sm:$0xff]  ;;  %v93_v12 = vld [vmem:[#allocation5 + $0x20] sm:$0xff]  ;;  %v94_v13 = vld [vmem:[#allocation5 + $0x28] sm:$0xff]  ;;  %v1050_v18 = vmov 5   ;;  %v1051_v22 = vmov 6   ;;  %v1052_v23 = vmov 7  }
  0x29   :  { %53 = vperm.xlu1 %961, %v38_v3   ;;  %42 = vperm.xlu0 %959, %v38_v3   ;;  %v827_v9 = vpack.c.bf16 %v92_v8, %v91_v7  ;;  %v830_v14 = vpack.c.bf16 %v94_v13, %v93_v12  ;;  %v95_v15 = vld [vmem:[#allocation5 + $0x30] sm:$0xff]  ;;  %v96_v16 = vld [vmem:[#allocation5 + $0x38] sm:$0xff]  ;;  %v97_v20 = vld [vmem:[#allocation5 + $0x40] sm:$0xff]  ;;  %vm1053_vm0 = vmmov 0   ;;  %v1054_v33 = vmov 0.0   ;;  %s1055_s1 = smov [#allocation7]  }
  0x2a   :  { %825 = vmatpush3.bf16.msra.mxu0 %v824_v6  ;;  %v833_v19 = vpack.c.bf16 %v96_v16, %v95_v15  ;;  %v98_v21 = vld [vmem:[#allocation5 + $0x48] sm:$0xff]  ;;  %v99_v25 = vld [vmem:[#allocation5 + $0x50] sm:$0xff]  ;;  %v100_v26 = vld [vmem:[#allocation5 + $0x58] sm:$0xff]  ;;  %680 = vmatprep.mubr.msk.f32.mxu0 %vm1053_vm0, %v1054_v33  ;;  %v40_v62 = vand.u32 127, %v39_v59  ;;  %s549_s6 = sshll.u32 %s1055_s1, 4  ;;  %s550_s6 = int_to_ptr.vmem [resolvable:$true] %s549_s6 }
  0x2b   :  { %826 = vmatprep.subr.bf16.mxu0 %v1046_v2  ;;  %v836_v24 = vpack.c.bf16 %v98_v21, %v97_v20  ;;  %v839_v27 = vpack.c.bf16 %v100_v26, %v99_v25  ;;  %v101_v28 = vld [vmem:[#allocation5 + $0x60] sm:$0xff]  ;;  %v102_v29 = vld [vmem:[#allocation5 + $0x68] sm:$0xff]  ;;  %v103_v31 = vld [vmem:[#allocation5 + $0x70] sm:$0xff]  ;;  %715 = vmatprep.mubr.msk.f32.mxu1 %vm1053_vm0, %v1054_v33  ;;  %s1012_s7 = scalar_lea.vmem %s550_s6, 128  ;;  %p1017_p3 = scmp.lt.s32.totalorder %s550_s6, %s550_s6 }
  0x2c   :  { %v842_v30 = vpack.c.bf16 %v102_v29, %v101_v28  ;;  %v104_v32 = vld [vmem:[#allocation5 + $0x78] sm:$0xff]  ;;  %v105_v34 = vld [vmem:[#allocation5 + $0x80] sm:$0xff]  ;;  %v106_v35 = vld [vmem:[#allocation5 + $0x88] sm:$0xff]  ;;  %p1013_p2 = scmp.ne.s32.totalorder %s550_s6, %s1012_s7  ;;  %p1018_p4 = scmp.lt.s32.totalorder %s1012_s7, %s1012_s7 }
  0x2d   :  { %962 = vset.pattern.permute.xlu1 %v1047_v10  ;;  %960 = vset.pattern.permute.xlu0 %v1048_v11  ;;  %v107_v36 = vld [vmem:[#allocation5 + $0x90] sm:$0xff]  ;;  %v845_v37 = vpack.c.bf16 %v104_v32, %v103_v31  ;;  %v848_v38 = vpack.c.bf16 %v106_v35, %v105_v34  ;;  %v108_v39 = vld [vmem:[#allocation5 + $0x98] sm:$0xff]  ;;  %v109_v41 = vld [vmem:[#allocation5 + $0xa0] sm:$0xff] }
  0x2e   :  { %59 = vperm.xlu1 %962, %v38_v3   ;;  %47 = vperm.xlu0 %960, %v38_v3   ;;  %v851_v40 = vpack.c.bf16 %v108_v39, %v107_v36  ;;  %v110_v42 = vld [vmem:[#allocation5 + $0xa8] sm:$0xff]  ;;  %v111_v44 = vld [vmem:[#allocation5 + $0xb0] sm:$0xff]  ;;  %v112_v45 = vld [vmem:[#allocation5 + $0xb8] sm:$0xff]  ;;  %p1019_p5 = por %p1018_p4, %p1017_p3 }
  0x2f   :  { %828 = vmatpush3.bf16.msra.mxu0 %v827_v9  ;;  %849 = vmatpush3.bf16.msra.mxu1 %v848_v38  ;;  %v854_v43 = vpack.c.bf16 %v110_v42, %v109_v41  ;;  %v857_v46 = vpack.c.bf16 %v112_v45, %v111_v44  ;;  %v113_v47 = vld [vmem:[#allocation5 + $0xc0] sm:$0xff]  ;;  %v114_v48 = vld [vmem:[#allocation5 + $0xc8] sm:$0xff]  ;;  %v115_v50 = vld [vmem:[#allocation5 + $0xd0] sm:$0xff] }
  0x30   :  { %829 = vmatprep.subr.bf16.mxu0 %v1046_v2  ;;  %850 = vmatprep.subr.bf16.mxu1 %v1046_v2  ;;  %v860_v49 = vpack.c.bf16 %v114_v48, %v113_v47  ;;  %v116_v51 = vld [vmem:[#allocation5 + $0xd8] sm:$0xff]  ;;  %v117_v53 = vld [vmem:[#allocation5 + $0xe0] sm:$0xff]  ;;  %v118_v54 = vld [vmem:[#allocation5 + $0xe8] sm:$0xff]  ;;  %p1020_p6 = pnand %p1019_p5, %p1013_p2 }
  0x31   :  { %v863_v52 = vpack.c.bf16 %v116_v51, %v115_v50  ;;  %v866_v55 = vpack.c.bf16 %v118_v54, %v117_v53  ;;  %v119_v56 = vld [vmem:[#allocation5 + $0xf0] sm:$0xff]  ;;  %v120_v57 = vld [vmem:[#allocation5 + $0xf8] sm:$0xff]  ;;  %v125_v29 = vld [vmem:[#allocation5 + $0x120] sm:$0xff] }
  0x32   :  { %963 = vset.pattern.permute.xlu1 %v1049_v17  ;;  %964 = vset.pattern.permute.xlu0 %v1050_v18  ;;  %v869_v58 = vpack.c.bf16 %v120_v57, %v119_v56  ;;  %v123_v25 = vld [vmem:[#allocation5 + $0x110] sm:$0xff]  ;;  %v128_v32 = vld [vmem:[#allocation5 + $0x138] sm:$0xff]  ;;  %v129_v35 = vld [vmem:[#allocation5 + $0x140] sm:$0xff] }
  0x33   :  { %65 = vperm.xlu1 %963, %v38_v3   ;;  %71 = vperm.xlu0 %964, %v38_v3   ;;  %v130_v36 = vld [vmem:[#allocation5 + $0x148] sm:$0xff]  ;;  %v131_v38 = vld [vmem:[#allocation5 + $0x150] sm:$0xff]  ;;  %v132_v39 = vld [vmem:[#allocation5 + $0x158] sm:$0xff] }
  0x34   :  { %831 = vmatpush3.bf16.msra.mxu0 %v830_v14  ;;  %852 = vmatpush3.bf16.msra.mxu1 %v851_v40  ;;  %v887_v40 = vpack.c.bf16 %v132_v39, %v131_v38  ;;  %v133_v41 = vld [vmem:[#allocation5 + $0x160] sm:$0xff]  ;;  %v134_v42 = vld [vmem:[#allocation5 + $0x168] sm:$0xff]  ;;  %v136_v47 = vld [vmem:[#allocation5 + $0x178] sm:$0xff] }
  0x35   :  { %832 = vmatprep.subr.bf16.mxu0 %v1046_v2  ;;  %853 = vmatprep.subr.bf16.mxu1 %v1046_v2  ;;  %v138_v50 = vld [vmem:[#allocation5 + $0x188] sm:$0xff]  ;;  %v139_v51 = vld [vmem:[#allocation5 + $0x190] sm:$0xff]  ;;  %v140_v53 = vld [vmem:[#allocation5 + $0x198] sm:$0xff] }
  0x36   :  { %v899_v54 = vpack.c.bf16 %v140_v53, %v139_v51  ;;  %v142_v56 = vld [vmem:[#allocation5 + $0x1a8] sm:$0xff]  ;;  %v144_v59 = vld [vmem:[#allocation5 + $0x1b8] sm:$0xff] }
  0x37   :  { %965 = vset.pattern.permute.xlu1 %v1051_v22  ;;  %967 = vset.pattern.permute.xlu0 %v1052_v23 }
  0x38   :  { %77 = vperm.xlu1 %965, %v38_v3   ;;  %834 = vmatpush3.bf16.msra.mxu0 %v833_v19 }
  0x39   :  { %835 = vmatprep.subr.bf16.mxu0 %v1046_v2  ;;  %855 = vmatpush3.bf16.msra.mxu1 %v854_v43  ;;  %v890_v43 = vpack.c.bf16 %v134_v42, %v133_v41  ;;  %v167_v41 = vld [vmem:[#allocation5 + $0x270] sm:$0xff]  ;;  %v168_v42 = vld [vmem:[#allocation5 + $0x278] sm:$0xff] }
  0x3a   :  { %856 = vmatprep.subr.bf16.mxu1 %v1046_v2 }
  0x3c   :  { %966 = vset.pattern.permute.xlu1 %v1052_v23  ;;  %837 = vmatpush3.bf16.msra.mxu0 %v836_v24  ;;  %v121_v23 = vld [vmem:[#allocation5 + $0x100] sm:$0xff]  ;;  %v122_v24 = vld [vmem:[#allocation5 + $0x108] sm:$0xff] }
  0x3d   :  { %83 = vperm.xlu1 %966, %v38_v3   ;;  %838 = vmatprep.subr.bf16.mxu0 %v1046_v2  ;;  %v872_v26 = vpack.c.bf16 %v122_v24, %v121_v23  ;;  %v158_v23 = vld [vmem:[#allocation5 + $0x228] sm:$0xff] }
  0x3e   :  { %858 = vmatpush3.bf16.msra.mxu1 %v857_v46  ;;  %v135_v46 = vld [vmem:[#allocation5 + $0x170] sm:$0xff] }
  0x3f   :  { %859 = vmatprep.subr.bf16.mxu1 %v1046_v2  ;;  %v893_v48 = vpack.c.bf16 %v136_v47, %v135_v46 }
  0x40   :  { %840 = vmatpush3.bf16.msra.mxu0 %v839_v27  ;;  %v124_v27 = vld [vmem:[#allocation5 + $0x118] sm:$0xff] }
  0x41   :  { %841 = vmatprep.subr.bf16.mxu0 %v1046_v2  ;;  %v875_v28 = vpack.c.bf16 %v124_v27, %v123_v25  ;;  %v160_v25 = vld [vmem:[#allocation5 + $0x238] sm:$0xff]  ;;  %v161_v27 = vld [vmem:[#allocation5 + $0x240] sm:$0xff] }
  0x42   :  { %861 = vmatpush3.bf16.msra.mxu1 %v860_v49  ;;  %v137_v49 = vld [vmem:[#allocation5 + $0x180] sm:$0xff] }
  0x43   :  { %862 = vmatprep.subr.bf16.mxu1 %v1046_v2 }
  0x44   :  { %843 = vmatpush3.bf16.msra.mxu0 %v842_v30  ;;  %v126_v30 = vld [vmem:[#allocation5 + $0x128] sm:$0xff] }
  0x45   :  { %844 = vmatprep.subr.bf16.mxu0 %v1046_v2  ;;  %v878_v31 = vpack.c.bf16 %v126_v30, %v125_v29  ;;  %v163_v30 = vld [vmem:[#allocation5 + $0x250] sm:$0xff] }
  0x46   :  { %864 = vmatpush3.bf16.msra.mxu1 %v863_v52  ;;  %v896_v52 = vpack.c.bf16 %v138_v50, %v137_v49  ;;  %v562_v49 = vld [vmem:[#allocation5 + $0x283] ss:$0 sm:$0xff] }
  0x47   :  { %865 = vmatprep.subr.bf16.mxu1 %v1046_v2 }
  0x48   :  { %846 = vmatpush3.bf16.msra.mxu0 %v845_v37  ;;  %v884_v37 = vpack.c.bf16 %v130_v36, %v129_v35  ;;  %v560_v36 = vld [vmem:[#allocation5 + $0x281] ss:$0 sm:$0xff] }
  0x49   :  { %871 = vmatprep.subr.bf16.mxu0 %v1046_v2 }
  0x4a   :  { %867 = vmatpush3.bf16.msra.mxu1 %v866_v55  ;;  %v141_v55 = vld [vmem:[#allocation5 + $0x1a0] sm:$0xff] }
  0x4b   :  { %868 = vmatprep.subr.bf16.mxu1 %v1046_v2  ;;  %v902_v57 = vpack.c.bf16 %v142_v56, %v141_v55 }
  0x4e   :  { %870 = vmatpush3.bf16.msra.mxu1 %v869_v58  ;;  %v143_v58 = vld [vmem:[#allocation5 + $0x1b0] sm:$0xff] }
  0x4f   :  { %895 = vmatprep.subr.bf16.mxu1 %v1046_v2 }
  0xa8   :  { %v54_v60 = vpop.permute.xlu1 %53  ;;  %v43_v61 = vpop.permute.xlu0 %42 }
  0xa9   :  { %vm44_vm1 = vcmp.eq.s32.totalorder %v43_v61, %v40_v62  ;;  %vm55_vm2 = vcmp.eq.s32.totalorder %v54_v60, %v40_v62  ;;  %v905_v60 = vpack.c.bf16 %v144_v59, %v143_v58  ;;  %v145_v61 = vld [vmem:[#allocation5 + $0x1c0] sm:$0xff] }
  0xaa   :  { %v45_v3 = vsel %vm44_vm1, 1, %v1045_v1  ;;  %v56_v6 = vsel %vm55_vm2, 1, %v1045_v1 }
  0xad   :  { %v60_v63 = vpop.permute.xlu1 %59  ;;  %v48_v0 = vpop.permute.xlu0 %47 }
  0xae   :  { %vm49_vm3 = vcmp.eq.s32.totalorder %v48_v0, %v40_v62  ;;  %vm61_vm4 = vcmp.eq.s32.totalorder %v60_v63, %v40_v62  ;;  %v147_v0 = vld [vmem:[#allocation5 + $0x1d0] sm:$0xff] }
  0xaf   :  { %v50_v4 = vsel %vm49_vm3, 1, %v1045_v1  ;;  %v62_v10 = vsel %vm61_vm4, 1, %v1045_v1 }
  0xb0   :  { %v51_v5 = vadd.s32 %v50_v4, %v45_v3  ;;  %v148_v3 = vld [vmem:[#allocation5 + $0x1d8] sm:$0xff] }
  0xb1   :  { %v911_v4 = vpack.c.bf16 %v148_v3, %v147_v0 }
  0xb2   :  { %v57_v7 = vadd.s32 %v56_v6, %v51_v5  ;;  %v66_v8 = vpop.permute.xlu1 %65  ;;  %v72_v9 = vpop.permute.xlu0 %71  ;;  %v149_v5 = vld [vmem:[#allocation5 + $0x1e0] sm:$0xff]  ;;  %v150_v6 = vld [vmem:[#allocation5 + $0x1e8] sm:$0xff] }
  0xb3   :  { %vm67_vm5 = vcmp.eq.s32.totalorder %v66_v8, %v40_v62  ;;  %vm73_vm6 = vcmp.eq.s32.totalorder %v72_v9, %v40_v62  ;;  %v559_v8 = vld [vmem:[#allocation5 + $0x280] ss:$0 sm:$0xff] }
  0xb4   :  { %v63_v11 = vadd.s32 %v62_v10, %v57_v7  ;;  %v68_v12 = vsel %vm67_vm5, 1, %v1045_v1  ;;  %v74_v14 = vsel %vm73_vm6, 1, %v1045_v1  ;;  %v914_v7 = vpack.c.bf16 %v150_v6, %v149_v5 }
  0xb6   :  { %v69_v13 = vadd.s32 %v68_v12, %v63_v11 }
  0xb7   :  { %v78_v15 = vpop.permute.xlu1 %77 }
  0xb8   :  { %vm79_vm7 = vcmp.eq.s32.totalorder %v78_v15, %v40_v62  ;;  %v75_v16 = vadd.s32 %v74_v14, %v69_v13  ;;  %v151_v13 = vld [vmem:[#allocation5 + $0x1f0] sm:$0xff]  ;;  %v152_v14 = vld [vmem:[#allocation5 + $0x1f8] sm:$0xff] }
  0xb9   :  { %v80_v17 = vsel %vm79_vm7, 1, %v1045_v1  ;;  %v917_v15 = vpack.c.bf16 %v152_v14, %v151_v13 }
  0xba   :  { %v81_v19 = vadd.s32 %v80_v17, %v75_v16  ;;  %v153_v16 = vld [vmem:[#allocation5 + $0x200] sm:$0xff]  ;;  %v154_v17 = vld [vmem:[#allocation5 + $0x208] sm:$0xff] }
  0xbc   :  { %v84_v18 = vpop.permute.xlu1 %83 }
  0xbd   :  { %vm85_vm8 = vcmp.eq.s32.totalorder %v84_v18, %v40_v62  ;;  %v146_v62 = vld [vmem:[#allocation5 + $0x1c8] sm:$0xff]  ;;  %v155_v18 = vld [vmem:[#allocation5 + $0x210] sm:$0xff] }
  0xbe   :  { %v86_v20 = vsel %vm85_vm8, 1, %v1045_v1  ;;  %v127_v1 = vld [vmem:[#allocation5 + $0x130] sm:$0xff]  ;;  %v908_v63 = vpack.c.bf16 %v146_v62, %v145_v61 }
  0xbf   :  { %v87_v21 = vadd.s32 %v86_v20, %v81_v19  ;;  %v881_v34 = vpack.c.bf16 %v128_v32, %v127_v1  ;;  %v920_v19 = vpack.c.bf16 %v154_v17, %v153_v16  ;;  %v156_v20 = vld [vmem:[#allocation5 + $0x218] sm:$0xff]  ;;  %v165_v32 = vld [vmem:[#allocation5 + $0x260] sm:$0xff] }
  0xc1   :  { %v88_v22 = vcvt.s32.f32 %v87_v21  ;;  %v923_v21 = vpack.c.bf16 %v156_v20, %v155_v18 }
  0xc3   :  { %681 = vmatmul.mubr.f32.vlgmr.msra.gmra.mrb[0].mxu0 %v88_v22  ;;  %v157_v22 = vld [vmem:[#allocation5 + $0x220] sm:$0xff] }
  0xc4   :  { %750 = vmatprep.mubr.msk.f32.mxu0 %vm1053_vm0, %v1054_v33  ;;  %873 = vmatpush3.bf16.msra.mxu0 %v872_v26  ;;  %v926_v24 = vpack.c.bf16 %v158_v23, %v157_v22 }
  0xc5   :  { %874 = vmatprep.subr.bf16.mxu0 %v1046_v2 }
  0xc8   :  { %876 = vmatpush3.bf16.msra.mxu0 %v875_v28  ;;  %v162_v28 = vld [vmem:[#allocation5 + $0x248] sm:$0xff] }
  0xc9   :  { %877 = vmatprep.subr.bf16.mxu0 %v1046_v2  ;;  %v932_v29 = vpack.c.bf16 %v162_v28, %v161_v27 }
  0xcc   :  { %879 = vmatpush3.bf16.msra.mxu0 %v878_v31  ;;  %v164_v31 = vld [vmem:[#allocation5 + $0x258] sm:$0xff] }
  0xcd   :  { %880 = vmatprep.subr.bf16.mxu0 %v1046_v2  ;;  %v935_v1 = vpack.c.bf16 %v164_v31, %v163_v30 }
  0xd0   :  { %882 = vmatpush3.bf16.msra.mxu0 %v881_v34  ;;  %v166_v34 = vld [vmem:[#allocation5 + $0x268] sm:$0xff] }
  0xd1   :  { %883 = vmatprep.subr.bf16.mxu0 %v1046_v2  ;;  %v938_v35 = vpack.c.bf16 %v166_v34, %v165_v32 }
  0xd4   :  { %885 = vmatpush3.bf16.msra.mxu0 %v884_v37 }
  0xd5   :  { %886 = vmatprep.subr.bf16.mxu0 %v1046_v2 }
  0xd8   :  { %888 = vmatpush3.bf16.msra.mxu0 %v887_v40 }
  0xd9   :  { %889 = vmatprep.subr.bf16.mxu0 %v1046_v2 }
  0xdc   :  { %891 = vmatpush3.bf16.msra.mxu0 %v890_v43  ;;  %v941_v43 = vpack.c.bf16 %v168_v42, %v167_v41 }
  0xdd   :  { %892 = vmatprep.subr.bf16.mxu0 %v1046_v2 }
  0xe0   :  { %894 = vmatpush3.bf16.msra.mxu0 %v893_v48 }
  0xe1   :  { %919 = vmatprep.subr.bf16.mxu0 %v1046_v2 }
 0x196   :  { %v239_v44 = vpop.f32.mrb[0].mxu0 }
 0x197   :  { %v682_v45 = vpop.f32.mrb[1].mxu0  ;;  %716 = vmatmul.mubr.f32.vlgmr.msra.gmra.mrb[0].mxu1 %v239_v44  ;;  %v561_v44 = vld [vmem:[#allocation5 + $0x282] ss:$0 sm:$0xff] }
 0x198   :  { %785 = vmatprep.mubr.msk.f32.mxu1 %vm1053_vm0, %v1054_v33  ;;  %897 = vmatpush3.bf16.msra.mxu1 %v896_v52 }
 0x199   :  { %898 = vmatprep.subr.bf16.mxu1 %v1046_v2 }
 0x19c   :  { %900 = vmatpush3.bf16.msra.mxu1 %v899_v54 }
 0x19d   :  { %901 = vmatprep.subr.bf16.mxu1 %v1046_v2 }
 0x1a0   :  { %903 = vmatpush3.bf16.msra.mxu1 %v902_v57 }
 0x1a1   :  { %904 = vmatprep.subr.bf16.mxu1 %v1046_v2 }
 0x1a4   :  { %906 = vmatpush3.bf16.msra.mxu1 %v905_v60 }
 0x1a5   :  { %907 = vmatprep.subr.bf16.mxu1 %v1046_v2 }
 0x1a8   :  { %909 = vmatpush3.bf16.msra.mxu1 %v908_v63 }
 0x1a9   :  { %910 = vmatprep.subr.bf16.mxu1 %v1046_v2 }
 0x1ac   :  { %912 = vmatpush3.bf16.msra.mxu1 %v911_v4 }
 0x1ad   :  { %913 = vmatprep.subr.bf16.mxu1 %v1046_v2 }
 0x1b0   :  { %915 = vmatpush3.bf16.msra.mxu1 %v914_v7 }
 0x1b1   :  { %916 = vmatprep.subr.bf16.mxu1 %v1046_v2 }
 0x1b4   :  { %918 = vmatpush3.bf16.msra.mxu1 %v917_v15 }
 0x26a   :  { %v313_v9 = vpop.f32.mrb[0].mxu1 }
 0x26b   :  { %v314_v10 = vadd.f32 %v559_v8, %v313_v9  ;;  %v717_v11 = vpop.f32.mrb[1].mxu1 }
 0x26d   :  { %v317_v12 = vmax.f32 %v314_v10, 0.0 }
 0x26f   :  { %751 = vmatmul.mubr.f32.vlgmr.msra.gmra.mrb[2].mxu0 %v317_v12 }
 0x270   :  { %820 = vmatprep.mubr.msk.f32.mxu0 %vm1053_vm0, %v1054_v33  ;;  %921 = vmatpush3.bf16.msra.mxu0 %v920_v19  ;;  %v159_v33 = vld [vmem:[#allocation5 + $0x230] sm:$0xff] }
 0x271   :  { %922 = vmatprep.subr.bf16.mxu0 %v1046_v2  ;;  %v929_v26 = vpack.c.bf16 %v160_v25, %v159_v33 }
 0x274   :  { %924 = vmatpush3.bf16.msra.mxu0 %v923_v21 }
 0x275   :  { %925 = vmatprep.subr.bf16.mxu0 %v1046_v2 }
 0x278   :  { %927 = vmatpush3.bf16.msra.mxu0 %v926_v24 }
 0x279   :  { %928 = vmatprep.subr.bf16.mxu0 %v1046_v2 }
 0x27c   :  { %930 = vmatpush3.bf16.msra.mxu0 %v929_v26 }
 0x27d   :  { %931 = vmatprep.subr.bf16.mxu0 %v1046_v2 }
 0x280   :  { %933 = vmatpush3.bf16.msra.mxu0 %v932_v29 }
 0x281   :  { %934 = vmatprep.subr.bf16.mxu0 %v1046_v2 }
 0x284   :  { %936 = vmatpush3.bf16.msra.mxu0 %v935_v1 }
 0x285   :  { %937 = vmatprep.subr.bf16.mxu0 %v1046_v2 }
 0x288   :  { %939 = vmatpush3.bf16.msra.mxu0 %v938_v35 }
 0x289   :  { %940 = vmatprep.subr.bf16.mxu0 %v1046_v2 }
 0x28c   :  { %942 = vmatpush3.bf16.msra.mxu0 %v941_v43 }
 0x342   :  { %v388_v37 = vpop.f32.mrb[2].mxu0 }
 0x343   :  { %v389_v38 = vadd.f32 %v560_v36, %v388_v37  ;;  %v752_v39 = vpop.f32.mrb[3].mxu0 }
 0x345   :  { %v392_v40 = vmax.f32 %v389_v38, 0.0 }
 0x347   :  { %786 = vmatmul.mubr.f32.vlgmr.msra.gmra.mrb[2].mxu1 %v392_v40 }
 0x41a   :  { %v463_v45 = vpop.f32.mrb[2].mxu1 }
 0x41b   :  { %v464_v46 = vadd.f32 %v561_v44, %v463_v45  ;;  %v787_v47 = vpop.f32.mrb[3].mxu1 }
 0x41d   :  { %v467_v48 = vmax.f32 %v464_v46, 0.0 }
 0x41f   :  { %821 = vmatmul.mubr.f32.vlgmr.msra.gmra.mrb[4].mxu0 %v467_v48 }
 0x4f2   :  { %v538_v2 = vpop.f32.mrb[4].mxu0 }
 0x4f3   :  { %v539_v50 = vadd.f32 %v562_v49, %v538_v2  ;;  %v822_v51 = vpop.f32.mrb[5].mxu0 }
 0x4f5   :  { %542 = vst [vmem:[#allocation7] sm:$0xff] %v539_v50 }
 0x4f6   :  { %1023 = shalt.err (!%p1020_p6)
}
 0x4f7   :  { %s1024_s10 = scalar_lea.hbm %s1175_s2, 128 }
 0x4f8   :  { %p1025_p7 = scmp.ne.s32.totalorder %s1175_s2, %s1024_s10  ;;  %p1028_p8 = scmp.lt.u32.totalorder %s1024_s10, %s1175_s2 }
 0x4fa   :  { %p1030_p9 = pnand %p1028_p8, %p1025_p7 }
 0x4fc   :  { %1033 = shalt.err (!%p1030_p9)
}
 0x4fd   :  { %552 = dma.vmem_to_hbm [thread:$0]  %s550_s6, 128, %s1175_s2, [#allocation4]  }
 0x4fe   :  { %1038 = dma.done.wait [#allocation4], 128  }
 0x4ff   :  { %1039 = vsyncadd [#allocation4], 4294967168 }
 0x500   :  { %556 = vsyncpa [#allocation3], 1 }
 0x501   :  { %557 = vsyncpa [#allocation6], 1 }
 0x502   :  { %558 = vsyncpa [#allocation4], 1 }

</bundles_post_ra>
